<compile_context>
chip_gen: v7x
topology: tpu7x:2x2x1
jax: 0.10.0
libtpu: 0.0.40
codegen_flags: <defaults>
</compile_context>

<pallas_src>
import math

import numpy as np
import jax
import jax.numpy as jnp
from jax import lax
from jax.experimental import pallas as pl
from jax.experimental.pallas import tpu as pltpu


# ----------------------------- configuration -----------------------------
# Small synthetic shapes consistent with the module (clip_layer='image_embeds'
# => num_input_tokens = 1, input_dim = projection_dim).
INPUT_DIM = 32            # CLIP projection dim (synthetic)
NUM_TOKENS = 4            # adapter_config.num_tokens == Embedder.num_output_tokens
OUTPUT_DIM = 64           # unet cross_attention_dim (synthetic)
MID_DIM = INPUT_DIM * NUM_TOKENS          # embedding_dim * num_tokens (as in __init__)
OUT_TOK = OUTPUT_DIM * NUM_TOKENS         # fc4 output width
VOCAB_SIZE = 64           # synthetic text-encoder token-embedding table size
LN_EPS = 1e-5


def _round_up(x, m):
    return ((x + m - 1) // m) * m


# Lane-dense padded widths of the packed weight-slab blocks.
MID_PAD = _round_up(MID_DIM, 128)     # 128  (== MID_DIM here)
OUT_PAD = _round_up(OUT_TOK, 128)     # 256  (== OUT_TOK here)
K_PAD = max(_round_up(INPUT_DIM, 16), MID_PAD)   # slab rows (bf16 sublane tile = 16)

# Column offsets of the four weight blocks inside the packed slab.
C1 = MID_PAD                # end of fc1 block
C2 = 2 * MID_PAD            # end of fc2 block
C3 = 3 * MID_PAD            # end of fc3 block
C4 = 3 * MID_PAD + OUT_PAD  # end of fc4 block
N_TOTAL = C4

W_BYTES = K_PAD * N_TOTAL * 2     # bf16 weight slab
B_BYTES = N_TOTAL * 4             # f32 bias slab

# Both LayerNorms see an unpadded feature axis in this configuration
# (x is passed with INPUT_DIM lanes; MID_PAD == MID_DIM), which the two-pass
# LayerNorm below relies on.
assert MID_PAD == MID_DIM, "two-pass LayerNorm assumes an unpadded mid axis"


# ------------------------------ math helpers -------------------------------
def _gelu_tanh(x):
    # tanh approximation: lowers to the EUP (idle slot behind the MXU pushes)
    # instead of the long erf VALU polynomial.
    c = math.sqrt(2.0 / math.pi)
    return 0.5 * x * (1.0 + jnp.tanh(c * (x + 0.044715 * x * x * x)))


def _gelu_erf(x):
    # nn.GELU() default (exact erf) — used only by the fp32 spec reference.
    return 0.5 * x * (1.0 + lax.erf(x * (1.0 / math.sqrt(2.0))))


def _layer_norm(x, true_dim):
    """Two-pass LayerNorm (E[(x-mu)^2]); requires x's lane count == true_dim."""
    assert x.shape[-1] == true_dim
    mu = jnp.mean(x, axis=-1, keepdims=True)
    d = x - mu
    var = jnp.mean(d * d, axis=-1, keepdims=True)
    return d * lax.rsqrt(var + LN_EPS)


def _dot(h, w, b):
    # bf16 MXU inputs, f32 accumulation.
    return jnp.dot(h.astype(jnp.bfloat16), w,
                   preferred_element_type=jnp.float32) + b


def _embedder_mlp(x, w, b):
    """LN -> fc1(+LN1 affine folded) -> GELU -> fc2 -> LN -> fc3(+LN2 affine)
    -> GELU -> fc4.  `w`/`b` may be VMEM Refs (kernel) or jnp arrays (ref)."""
    k_in = x.shape[-1]                 # INPUT_DIM (x is passed unpadded)
    h = _layer_norm(x, k_in)
    h = _dot(h, w[0:k_in, 0:C1], b[:, 0:C1])[:, :MID_DIM]        # fc1'
    h = _gelu_tanh(h)
    h = _dot(h, w[0:MID_DIM, C1:C2], b[:, C1:C2])[:, :MID_DIM]   # fc2
    h = _layer_norm(h, MID_DIM)
    h = _dot(h, w[0:MID_DIM, C2:C3], b[:, C2:C3])[:, :MID_DIM]   # fc3'
    h = _gelu_tanh(h)
    h = _dot(h, w[0:MID_DIM, C3:C4], b[:, C3:C4])                # fc4 -> (S, OUT_PAD)
    return h


def _embedder_cost(n_rows):
    flops = 2 * n_rows * (INPUT_DIM * MID_PAD + 2 * MID_PAD * MID_PAD
                          + MID_PAD * OUT_PAD)
    transcendentals = 2 * n_rows * MID_PAD          # two tanh-GELU layers
    bytes_accessed = W_BYTES + B_BYTES + n_rows * (INPUT_DIM + OUT_PAD) * 4
    return pl.CostEstimate(flops=flops, transcendentals=transcendentals,
                           bytes_accessed=bytes_accessed)


# ------------------------------- kernels ----------------------------------
def embedder_kernel(x_ref, w_ref, b_ref, out_ref):
    """Standalone (batched) Embedder MLP.

    x_ref:   (rows, INPUT_DIM)  f32   (unpadded feature axis)
    w_ref:   (K_PAD, N_TOTAL)   bf16  packed weight slab [w1'|w2|w3'|w4]
    b_ref:   (1, N_TOTAL)       f32   packed bias slab   [b1'|b2|b3'|b4]
    out_ref: (rows, OUT_PAD)    f32
    """
    out_ref[...] = _embedder_mlp(x_ref[...], w_ref, b_ref).astype(out_ref.dtype)


def fused_adapter_kernel(ids_ref, x_ref, w_ref, b_ref, table_in_ref,
                         out_ref, table_out_ref, vec_scratch, sem):
    """Fused ClipVisionAdapter.forward: Embedder MLP + set_vec scatter.

    ids_ref:       (NUM_TOKENS,) i32 in SMEM — placeholder token ids.
    x_ref:         (1, INPUT_DIM) f32 — CLIP image embeds row.
    table_in_ref / table_out_ref: (VOCAB, OUTPUT_DIM) in HBM, aliased
                   (input_output_aliases) so only NUM_TOKENS rows are touched.
    out_ref:       (1, OUT_PAD) f32 — image_prompt_embeds (flattened tokens).
    vec_scratch:   (NUM_TOKENS, OUTPUT_DIM) f32 VMEM staging for the scatter.
    """
    del table_in_ref  # same buffer as table_out_ref

    h = _embedder_mlp(x_ref[...], w_ref, b_ref)          # (1, OUT_PAD)
    out_ref[...] = h.astype(out_ref.dtype)

    # Stage the NUM_TOKENS token vectors as rows (static lane slices, no reshape).
    for t in range(NUM_TOKENS):
        vec_scratch[t:t + 1, :] = h[0:1, t * OUTPUT_DIM:(t + 1) * OUTPUT_DIM]

    # Contiguous-id fast path: one (NUM_TOKENS, OUTPUT_DIM) DMA instead of
    # NUM_TOKENS per-row descriptors.  Contiguity decided from SMEM scalars.
    contig = ids_ref[1] == ids_ref[0] + 1
    for t in range(2, NUM_TOKENS):
        contig = jnp.logical_and(contig, ids_ref[t] == ids_ref[0] + t)

    @pl.when(contig)
    def _():
        cp = pltpu.make_async_copy(
            vec_scratch, table_out_ref.at[pl.ds(ids_ref[0], NUM_TOKENS)],
            sem.at[0])
        cp.start()
        cp.wait()

    @pl.when(jnp.logical_not(contig))
    def _():
        # TODO(synk): duplicate ids would issue racing DMAs (the PyTorch loop
        # is last-write-wins); ids are unique by construction in the adapter.
        for t in range(NUM_TOKENS):
            pltpu.make_async_copy(vec_scratch.at[pl.ds(t, 1)],
                                  table_out_ref.at[pl.ds(ids_ref[t], 1)],
                                  sem.at[t]).start()
        for t in range(NUM_TOKENS):
            pltpu.make_async_copy(vec_scratch.at[pl.ds(t, 1)],
                                  table_out_ref.at[pl.ds(ids_ref[t], 1)],
                                  sem.at[t]).wait()


# ------------------------------ wrappers -----------------------------------
_VMEM = pl.BlockSpec(memory_space=pltpu.MemorySpace.VMEM)
_SMEM = pl.BlockSpec(memory_space=pltpu.MemorySpace.SMEM)
_ANY = pl.BlockSpec(memory_space=pl.ANY)


def embedder_forward_pallas(x_2d, w_slab, b_slab, *, row_tile=256):
    """Batched Embedder: (S, INPUT_DIM) -> (S, OUT_TOK).

    Small S: one full-array block (weights ~160 KiB bf16, trivially in VMEM).
    Large S: row grid marked "parallel" so v7x's two TensorCores split rows;
    the weight/bias slabs keep a constant index_map so they stay resident.
    Per-step VMEM (2x double-buffered blocks + slabs) is well under v7x's
    32 MiB scoped default / 64 MiB physical.
    """
    S = x_2d.shape[0]
    x = x_2d.astype(jnp.float32)

    if S <= row_tile:
        out = pl.pallas_call(
            embedder_kernel,
            out_shape=jax.ShapeDtypeStruct((S, OUT_PAD), jnp.float32),
            in_specs=[_VMEM, _VMEM, _VMEM],
            out_specs=_VMEM,
            cost_estimate=_embedder_cost(S),
        )(x, w_slab, b_slab)
    else:
        s_pad = _round_up(S, row_tile)
        if s_pad != S:
            x = jnp.zeros((s_pad, INPUT_DIM), jnp.float32).at[:S].set(x)
        out = pl.pallas_call(
            embedder_kernel,
            out_shape=jax.ShapeDtypeStruct((s_pad, OUT_PAD), jnp.float32),
            grid=(s_pad // row_tile,),
            in_specs=[pl.BlockSpec((row_tile, INPUT_DIM), lambda i: (i, 0)),
                      pl.BlockSpec((K_PAD, N_TOTAL), lambda i: (0, 0)),
                      pl.BlockSpec((1, N_TOTAL), lambda i: (0, 0))],
            out_specs=pl.BlockSpec((row_tile, OUT_PAD), lambda i: (i, 0)),
            compiler_params=pltpu.CompilerParams(
                dimension_semantics=("parallel",)),
            cost_estimate=_embedder_cost(s_pad),
        )(x, w_slab, b_slab)
        out = out[:S]

    return out if OUT_TOK == OUT_PAD else out[:, :OUT_TOK]


def clip_vision_adapter_forward(clip_image_embeds, w_slab, b_slab,
                                token_embed_table, placeholder_token_ids):
    """Mirrors ClipVisionAdapter.forward (single text encoder): Embedder MLP on
    the CLIP image embeds, then set_vec writes the NUM_TOKENS resulting vectors
    into the text-encoder token-embedding table — all in ONE pallas_call with
    the table aliased in place.  (The PyTorch forward returns None; its effect
    is the in-place embedding update, reproduced here functionally.)"""
    x = clip_image_embeds.astype(jnp.float32)
    if x.ndim == 2:
        x = x[:, None, :]                         # unsqueeze(1)
    B, T, D = x.shape
    if B * T != 1:
        raise ValueError("Batch size must be 1 for embedder for now")
    x_row = x.reshape(1, D)

    cost = _embedder_cost(1)
    out_row, new_table = pl.pallas_call(
        fused_adapter_kernel,
        out_shape=(jax.ShapeDtypeStruct((1, OUT_PAD), jnp.float32),
                   jax.ShapeDtypeStruct(token_embed_table.shape,
                                        token_embed_table.dtype)),
        in_specs=[_SMEM, _VMEM, _VMEM, _VMEM, _ANY],
        out_specs=(_VMEM, _ANY),
        scratch_shapes=[pltpu.VMEM((NUM_TOKENS, OUTPUT_DIM), jnp.float32),
                        pltpu.SemaphoreType.DMA((NUM_TOKENS,))],
        input_output_aliases={4: 1},   # table input buffer == table output
        cost_estimate=cost,
    )(placeholder_token_ids, x_row, w_slab, b_slab, token_embed_table)

    flat = out_row if OUT_TOK == OUT_PAD else out_row[:, :OUT_TOK]
    image_prompt_embeds = flat.reshape(-1, NUM_TOKENS, OUTPUT_DIM)
    # TODO(synk): tokenizer / CLIPImageProcessor / CLIPVisionModelWithProjection
    # preprocessing is host-side glue with no Pallas equivalent.
    return image_prompt_embeds, new_table


# --------------------------- parameter handling ----------------------------
def init_embedder_params(key, zero_extra_layers=False):
    """Embedder parameters (weights stored as (in_features, out_features)).
    zero_extra_layers=True mirrors the module's fc2/fc3/fc4 zero init; the
    test path uses random nonzero weights so all layers are exercised."""
    def linear(k, fan_in, fan_out, zero_weight=False):
        kw, kb = jax.random.split(k)
        bound = 1.0 / math.sqrt(fan_in)
        w = (jnp.zeros((fan_in, fan_out), jnp.float32) if zero_weight else
             jax.random.uniform(kw, (fan_in, fan_out), jnp.float32, -bound, bound))
        b = jax.random.uniform(kb, (1, fan_out), jnp.float32, -bound, bound)
        return w, b

    ks = jax.random.split(key, 8)
    w1, b1 = linear(ks[0], INPUT_DIM, MID_DIM)
    w2, b2 = linear(ks[1], MID_DIM, MID_DIM, zero_weight=zero_extra_layers)
    w3, b3 = linear(ks[2], MID_DIM, MID_DIM, zero_weight=zero_extra_layers)
    w4, b4 = linear(ks[3], MID_DIM, OUT_TOK, zero_weight=zero_extra_layers)
    ln1_w = 1.0 + 0.1 * jax.random.normal(ks[4], (1, INPUT_DIM), jnp.float32)
    ln1_b = 0.1 * jax.random.normal(ks[5], (1, INPUT_DIM), jnp.float32)
    ln2_w = 1.0 + 0.1 * jax.random.normal(ks[6], (1, MID_DIM), jnp.float32)
    ln2_b = 0.1 * jax.random.normal(ks[7], (1, MID_DIM), jnp.float32)
    return {"ln1_w": ln1_w, "ln1_b": ln1_b, "w1": w1, "b1": b1,
            "w2": w2, "b2": b2, "ln2_w": ln2_w, "ln2_b": ln2_b,
            "w3": w3, "b3": b3, "w4": w4, "b4": b4}


def pack_embedder_params(params):
    """Host-side prep: fold the LayerNorm affines into the adjacent Linear
    (w1' = diag(g1)@w1, b1' = beta1@w1 + b1; same for LN2 into fc3), zero-pad
    to lane-aligned block widths, and pack into ONE bf16 weight slab + ONE f32
    bias slab (2 parameter DMAs instead of 12, lane-dense, half the weight bytes)."""
    w1f = params["w1"] * params["ln1_w"].reshape(-1, 1)
    b1f = params["ln1_b"].reshape(1, -1) @ params["w1"] + params["b1"]
    w3f = params["w3"] * params["ln2_w"].reshape(-1, 1)
    b3f = params["ln2_b"].reshape(1, -1) @ params["w3"] + params["b3"]

    w_slab = jnp.zeros((K_PAD, N_TOTAL), jnp.float32)
    w_slab = w_slab.at[:INPUT_DIM, 0:MID_DIM].set(w1f)
    w_slab = w_slab.at[:MID_DIM, C1:C1 + MID_DIM].set(params["w2"])
    w_slab = w_slab.at[:MID_DIM, C2:C2 + MID_DIM].set(w3f)
    w_slab = w_slab.at[:MID_DIM, C3:C3 + OUT_TOK].set(params["w4"])

    b_slab = jnp.zeros((1, N_TOTAL), jnp.float32)
    b_slab = b_slab.at[:, 0:MID_DIM].set(b1f)
    b_slab = b_slab.at[:, C1:C1 + MID_DIM].set(params["b2"])
    b_slab = b_slab.at[:, C2:C2 + MID_DIM].set(b3f)
    b_slab = b_slab.at[:, C3:C3 + OUT_TOK].set(params["b4"])

    return w_slab.astype(jnp.bfloat16), b_slab


# ---------------------------- pure-JAX references ---------------------------
def embedder_forward_packed_ref(x_2d, w_slab, b_slab):
    """Pure-JAX transcription of exactly what the kernels compute (same packed
    bf16 params, same tanh GELU, same op order)."""
    h = _embedder_mlp(x_2d.astype(jnp.float32), w_slab, b_slab)
    return h if OUT_TOK == OUT_PAD else h[:, :OUT_TOK]


def embedder_forward_spec_ref(x_2d, params):
    """Literal PyTorch-order fp32 Embedder forward (erf GELU, LN affine not
    folded) — loose semantic reference."""
    def ln(x, g, beta):
        m = jnp.mean(x, -1, keepdims=True)
        v = jnp.mean((x - m) ** 2, -1, keepdims=True)
        return (x - m) / jnp.sqrt(v + LN_EPS) * g + beta

    h = ln(x_2d, params["ln1_w"], params["ln1_b"])
    h = h @ params["w1"] + params["b1"]
    h = _gelu_erf(h)
    h = h @ params["w2"] + params["b2"]
    h = ln(h, params["ln2_w"], params["ln2_b"])
    h = h @ params["w3"] + params["b3"]
    h = _gelu_erf(h)
    h = h @ params["w4"] + params["b4"]
    return h


# --------------------------------- main ------------------------------------
if __name__ == "__main__":
    key = jax.random.PRNGKey(0)
    k_params, k_x, k_tbl, k_tbl2, k_b16, k_b384 = jax.random.split(key, 6)

    # Random nonzero weights so every layer is exercised numerically (the real
    # module zero-inits fc2/fc3/fc4 at construction; the kernel handles either).
    params = init_embedder_params(k_params, zero_extra_layers=False)
    w_slab, b_slab = pack_embedder_params(params)

    # clip_layer == 'image_embeds'  =>  input is (B=1, projection_dim)
    clip_image_embeds = jax.random.normal(k_x, (1, INPUT_DIM), jnp.float32)

    # Synthetic text-encoder embedding table + contiguous placeholder token ids.
    token_embed_table = 0.02 * jax.random.normal(
        k_tbl, (VOCAB_SIZE, OUTPUT_DIM), jnp.float32)
    ids_contig = jnp.arange(VOCAB_SIZE - NUM_TOKENS, VOCAB_SIZE, dtype=jnp.int32)

    table_before = np.asarray(token_embed_table)
    ids_np = np.asarray(ids_contig)

    adapter = jax.jit(clip_vision_adapter_forward, donate_argnums=(3,))
    ipe, new_table = adapter(clip_image_embeds, w_slab, b_slab,
                             token_embed_table, ids_contig)
    ipe = jax.block_until_ready(ipe)
    new_table = np.asarray(jax.block_until_ready(new_table))

    assert ipe.shape == (1, NUM_TOKENS, OUTPUT_DIM)

    # 1) Tight check vs. a pure-JAX transcription of the packed kernel math.
    ref_packed = embedder_forward_packed_ref(
        clip_image_embeds, w_slab, b_slab).reshape(-1, NUM_TOKENS, OUTPUT_DIM)
    assert jnp.allclose(ipe, ref_packed, atol=5e-3, rtol=5e-3), \
        "mismatch vs packed reference"

    # 2) Loose semantic check vs. the PyTorch-order fp32 forward (bf16 weights,
    #    folded LN affines and tanh GELU introduce ~1e-2-level differences).
    ref_spec = embedder_forward_spec_ref(
        clip_image_embeds, params).reshape(-1, NUM_TOKENS, OUTPUT_DIM)
    assert jnp.allclose(ipe, ref_spec, atol=1e-1, rtol=1e-1), \
        "mismatch vs fp32 spec reference"

    # 3) Fused set_vec, contiguous ids (single coalesced DMA path): placeholder
    #    rows replaced, every other row untouched.
    np.testing.assert_allclose(new_table[ids_np], np.asarray(ipe[0]), atol=1e-6)
    untouched = np.ones(VOCAB_SIZE, dtype=bool)
    untouched[ids_np] = False
    np.testing.assert_array_equal(new_table[untouched], table_before[untouched])

    # 4) Fused set_vec, NON-contiguous ids (per-row DMA fallback path).
    table2 = 0.02 * jax.random.normal(k_tbl2, (VOCAB_SIZE, OUTPUT_DIM), jnp.float32)
    ids_scatter = jnp.array([3, 10, 25, 57], dtype=jnp.int32)
    table2_before = np.asarray(table2)
    ids2_np = np.asarray(ids_scatter)
    ipe2, new_table2 = adapter(clip_image_embeds, w_slab, b_slab,
                               table2, ids_scatter)
    ipe2 = np.asarray(jax.block_until_ready(ipe2))
    new_table2 = np.asarray(jax.block_until_ready(new_table2))
    np.testing.assert_allclose(new_table2[ids2_np], ipe2[0], atol=1e-6)
    untouched2 = np.ones(VOCAB_SIZE, dtype=bool)
    untouched2[ids2_np] = False
    np.testing.assert_array_equal(new_table2[untouched2], table2_before[untouched2])

    # 5) Batched Embedder, gridless path (S=16) vs the packed reference.
    xb = jax.random.normal(k_b16, (16, INPUT_DIM), jnp.float32)
    out_b = jax.block_until_ready(embedder_forward_pallas(xb, w_slab, b_slab))
    ref_b = embedder_forward_packed_ref(xb, w_slab, b_slab)
    assert jnp.allclose(out_b, ref_b, atol=5e-3, rtol=5e-3), \
        "batched (gridless) mismatch vs packed reference"

    # 6) Batched Embedder, row-grid "parallel" path (S=384 -> 2 grid steps).
    xg = jax.random.normal(k_b384, (384, INPUT_DIM), jnp.float32)
    out_g = jax.block_until_ready(embedder_forward_pallas(xg, w_slab, b_slab))
    ref_g = embedder_forward_packed_ref(xg, w_slab, b_slab)
    assert jnp.allclose(out_g, ref_g, atol=5e-3, rtol=5e-3), \
        "batched (grid) mismatch vs packed reference"

    print("KERNEL_OK")
</pallas_src>

<mosaic_0001>
module attributes {stable_mosaic.version = 11 : i64} {
  func.func @fused_adapter_kernel(%arg0: memref<4xi32, #tpu.memory_space<smem>>, %arg1: memref<1x32xf32, #tpu.memory_space<vmem>>, %arg2: memref<128x640xbf16, #tpu.memory_space<vmem>>, %arg3: memref<1x640xf32, #tpu.memory_space<vmem>>, %arg4: memref<64x64xf32, #tpu.memory_space<any>>, %arg5: memref<1x256xf32, #tpu.memory_space<vmem>>, %arg6: memref<64x64xf32, #tpu.memory_space<any>>, %arg7: memref<4x64xf32, #tpu.memory_space<vmem>>, %arg8: memref<4x!tpu.dma_semaphore, #tpu.memory_space<semaphore_mem>>) attributes {dimension_semantics = [], scalar_prefetch = 0 : i64, scratch_operands = 2 : i64, tpu.core_type = #tpu.core_type<tc>} {
    %c0 = arith.constant 0 : index
    %c0_0 = arith.constant 0 : index
    %0 = vector.load %arg1[%c0, %c0_0] : memref<1x32xf32, #tpu.memory_space<vmem>>, vector<1x32xf32>
    %cst = arith.constant dense<0.000000e+00> : vector<1xf32>
    %1 = vector.multi_reduction <add>, %0, %cst [1] : vector<1x32xf32> to vector<1xf32>
    %2 = vector.shape_cast %1 : vector<1xf32> to vector<1x1xf32>
    %cst_1 = arith.constant 3.200000e+01 : f32
    %3 = vector.broadcast %cst_1 : f32 to vector<1x1xf32>
    %4 = arith.divf %2, %3 : vector<1x1xf32>
    %5 = vector.broadcast %4 : vector<1x1xf32> to vector<1x32xf32>
    %6 = arith.subf %0, %5 : vector<1x32xf32>
    %7 = arith.mulf %6, %6 : vector<1x32xf32>
    %cst_2 = arith.constant dense<0.000000e+00> : vector<1xf32>
    %8 = vector.multi_reduction <add>, %7, %cst_2 [1] : vector<1x32xf32> to vector<1xf32>
    %9 = vector.shape_cast %8 : vector<1xf32> to vector<1x1xf32>
    %cst_3 = arith.constant 3.200000e+01 : f32
    %10 = vector.broadcast %cst_3 : f32 to vector<1x1xf32>
    %11 = arith.divf %9, %10 : vector<1x1xf32>
    %cst_4 = arith.constant 9.99999974E-6 : f32
    %12 = vector.broadcast %cst_4 : f32 to vector<1x1xf32>
    %13 = arith.addf %11, %12 : vector<1x1xf32>
    %14 = math.rsqrt %13 : vector<1x1xf32>
    %15 = vector.broadcast %14 : vector<1x1xf32> to vector<1x32xf32>
    %16 = arith.mulf %6, %15 : vector<1x32xf32>
    %c0_5 = arith.constant 0 : index
    %c0_6 = arith.constant 0 : index
    %17 = vector.load %arg2[%c0_5, %c0_6] : memref<128x640xbf16, #tpu.memory_space<vmem>>, vector<32x128xbf16>
    %c0_7 = arith.constant 0 : index
    %c0_8 = arith.constant 0 : index
    %18 = vector.load %arg3[%c0_7, %c0_8] : memref<1x640xf32, #tpu.memory_space<vmem>>, vector<1x128xf32>
    %19 = arith.truncf %16 : vector<1x32xf32> to vector<1x32xbf16>
    %cst_9 = arith.constant dense<0.000000e+00> : vector<1x128xf32>
    %20 = tpu.matmul %19, %17, %cst_9 {dimension_numbers = #tpu.dot_dimension_numbers<[1], [0], [0], [1], [0, 0, 1, 1], [], []>} : vector<1x32xbf16>, vector<32x128xbf16>, vector<1x128xf32> -> vector<1x128xf32>
    %21 = arith.addf %20, %18 : vector<1x128xf32>
    %cst_10 = arith.constant 5.000000e-01 : f32
    %22 = vector.broadcast %cst_10 : f32 to vector<1x128xf32>
    %23 = arith.mulf %22, %21 : vector<1x128xf32>
    %cst_11 = arith.constant 4.471500e-02 : f32
    %24 = vector.broadcast %cst_11 : f32 to vector<1x128xf32>
    %25 = arith.mulf %24, %21 : vector<1x128xf32>
    %26 = arith.mulf %25, %21 : vector<1x128xf32>
    %27 = arith.mulf %26, %21 : vector<1x128xf32>
    %28 = arith.addf %21, %27 : vector<1x128xf32>
    %cst_12 = arith.constant 0.797884583 : f32
    %29 = vector.broadcast %cst_12 : f32 to vector<1x128xf32>
    %30 = arith.mulf %29, %28 : vector<1x128xf32>
    %31 = math.tanh %30 : vector<1x128xf32>
    %cst_13 = arith.constant 1.000000e+00 : f32
    %32 = vector.broadcast %cst_13 : f32 to vector<1x128xf32>
    %33 = arith.addf %32, %31 : vector<1x128xf32>
    %34 = arith.mulf %23, %33 : vector<1x128xf32>
    %c0_14 = arith.constant 0 : index
    %c128 = arith.constant 128 : index
    %35 = vector.load %arg2[%c0_14, %c128] : memref<128x640xbf16, #tpu.memory_space<vmem>>, vector<128x128xbf16>
    %c0_15 = arith.constant 0 : index
    %c128_16 = arith.constant 128 : index
    %36 = vector.load %arg3[%c0_15, %c128_16] : memref<1x640xf32, #tpu.memory_space<vmem>>, vector<1x128xf32>
    %37 = arith.truncf %34 : vector<1x128xf32> to vector<1x128xbf16>
    %cst_17 = arith.constant dense<0.000000e+00> : vector<1x128xf32>
    %38 = tpu.matmul %37, %35, %cst_17 {dimension_numbers = #tpu.dot_dimension_numbers<[1], [0], [0], [1], [0, 0, 1, 1], [], []>} : vector<1x128xbf16>, vector<128x128xbf16>, vector<1x128xf32> -> vector<1x128xf32>
    %39 = arith.addf %38, %36 : vector<1x128xf32>
    %cst_18 = arith.constant dense<0.000000e+00> : vector<1xf32>
    %40 = vector.multi_reduction <add>, %39, %cst_18 [1] : vector<1x128xf32> to vector<1xf32>
    %41 = vector.shape_cast %40 : vector<1xf32> to vector<1x1xf32>
    %cst_19 = arith.constant 1.280000e+02 : f32
    %42 = vector.broadcast %cst_19 : f32 to vector<1x1xf32>
    %43 = arith.divf %41, %42 : vector<1x1xf32>
    %44 = vector.broadcast %43 : vector<1x1xf32> to vector<1x128xf32>
    %45 = arith.subf %39, %44 : vector<1x128xf32>
    %46 = arith.mulf %45, %45 : vector<1x128xf32>
    %cst_20 = arith.constant dense<0.000000e+00> : vector<1xf32>
    %47 = vector.multi_reduction <add>, %46, %cst_20 [1] : vector<1x128xf32> to vector<1xf32>
    %48 = vector.shape_cast %47 : vector<1xf32> to vector<1x1xf32>
    %cst_21 = arith.constant 1.280000e+02 : f32
    %49 = vector.broadcast %cst_21 : f32 to vector<1x1xf32>
    %50 = arith.divf %48, %49 : vector<1x1xf32>
    %cst_22 = arith.constant 9.99999974E-6 : f32
    %51 = vector.broadcast %cst_22 : f32 to vector<1x1xf32>
    %52 = arith.addf %50, %51 : vector<1x1xf32>
    %53 = math.rsqrt %52 : vector<1x1xf32>
    %54 = vector.broadcast %53 : vector<1x1xf32> to vector<1x128xf32>
    %55 = arith.mulf %45, %54 : vector<1x128xf32>
    %c0_23 = arith.constant 0 : index
    %c256 = arith.constant 256 : index
    %56 = vector.load %arg2[%c0_23, %c256] : memref<128x640xbf16, #tpu.memory_space<vmem>>, vector<128x128xbf16>
    %c0_24 = arith.constant 0 : index
    %c256_25 = arith.constant 256 : index
    %57 = vector.load %arg3[%c0_24, %c256_25] : memref<1x640xf32, #tpu.memory_space<vmem>>, vector<1x128xf32>
    %58 = arith.truncf %55 : vector<1x128xf32> to vector<1x128xbf16>
    %cst_26 = arith.constant dense<0.000000e+00> : vector<1x128xf32>
    %59 = tpu.matmul %58, %56, %cst_26 {dimension_numbers = #tpu.dot_dimension_numbers<[1], [0], [0], [1], [0, 0, 1, 1], [], []>} : vector<1x128xbf16>, vector<128x128xbf16>, vector<1x128xf32> -> vector<1x128xf32>
    %60 = arith.addf %59, %57 : vector<1x128xf32>
    %cst_27 = arith.constant 5.000000e-01 : f32
    %61 = vector.broadcast %cst_27 : f32 to vector<1x128xf32>
    %62 = arith.mulf %61, %60 : vector<1x128xf32>
    %cst_28 = arith.constant 4.471500e-02 : f32
    %63 = vector.broadcast %cst_28 : f32 to vector<1x128xf32>
    %64 = arith.mulf %63, %60 : vector<1x128xf32>
    %65 = arith.mulf %64, %60 : vector<1x128xf32>
    %66 = arith.mulf %65, %60 : vector<1x128xf32>
    %67 = arith.addf %60, %66 : vector<1x128xf32>
    %cst_29 = arith.constant 0.797884583 : f32
    %68 = vector.broadcast %cst_29 : f32 to vector<1x128xf32>
    %69 = arith.mulf %68, %67 : vector<1x128xf32>
    %70 = math.tanh %69 : vector<1x128xf32>
    %cst_30 = arith.constant 1.000000e+00 : f32
    %71 = vector.broadcast %cst_30 : f32 to vector<1x128xf32>
    %72 = arith.addf %71, %70 : vector<1x128xf32>
    %73 = arith.mulf %62, %72 : vector<1x128xf32>
    %c0_31 = arith.constant 0 : index
    %c384 = arith.constant 384 : index
    %74 = vector.load %arg2[%c0_31, %c384] : memref<128x640xbf16, #tpu.memory_space<vmem>>, vector<128x256xbf16>
    %c0_32 = arith.constant 0 : index
    %c384_33 = arith.constant 384 : index
    %75 = vector.load %arg3[%c0_32, %c384_33] : memref<1x640xf32, #tpu.memory_space<vmem>>, vector<1x256xf32>
    %76 = arith.truncf %73 : vector<1x128xf32> to vector<1x128xbf16>
    %cst_34 = arith.constant dense<0.000000e+00> : vector<1x256xf32>
    %77 = tpu.matmul %76, %74, %cst_34 {dimension_numbers = #tpu.dot_dimension_numbers<[1], [0], [0], [1], [0, 0, 1, 1], [], []>} : vector<1x128xbf16>, vector<128x256xbf16>, vector<1x256xf32> -> vector<1x256xf32>
    %78 = arith.addf %77, %75 : vector<1x256xf32>
    %c0_35 = arith.constant 0 : index
    %c0_36 = arith.constant 0 : index
    %79 = vector.load %arg5[%c0_35, %c0_36] : memref<1x256xf32, #tpu.memory_space<vmem>>, vector<1x256xf32>
    tpu.vector_store %arg5[%c0_35, %c0_36], %78 {strides = array<i32>} : memref<1x256xf32, #tpu.memory_space<vmem>>, vector<1x256xf32>,
    %80 = vector.extract_strided_slice %78 {offsets = [0, 0], sizes = [1, 64], strides = [1, 1]} : vector<1x256xf32> to vector<1x64xf32>
    %c0_37 = arith.constant 0 : index
    %c0_38 = arith.constant 0 : index
    %81 = vector.load %arg7[%c0_37, %c0_38] : memref<4x64xf32, #tpu.memory_space<vmem>>, vector<1x64xf32>
    tpu.vector_store %arg7[%c0_37, %c0_38], %80 {strides = array<i32>} : memref<4x64xf32, #tpu.memory_space<vmem>>, vector<1x64xf32>,
    %82 = vector.extract_strided_slice %78 {offsets = [0, 64], sizes = [1, 64], strides = [1, 1]} : vector<1x256xf32> to vector<1x64xf32>
    %c1 = arith.constant 1 : index
    %c0_39 = arith.constant 0 : index
    %83 = vector.load %arg7[%c1, %c0_39] : memref<4x64xf32, #tpu.memory_space<vmem>>, vector<1x64xf32>
    tpu.vector_store %arg7[%c1, %c0_39], %82 {strides = array<i32>} : memref<4x64xf32, #tpu.memory_space<vmem>>, vector<1x64xf32>,
    %84 = vector.extract_strided_slice %78 {offsets = [0, 128], sizes = [1, 64], strides = [1, 1]} : vector<1x256xf32> to vector<1x64xf32>
    %c2 = arith.constant 2 : index
    %c0_40 = arith.constant 0 : index
    %85 = vector.load %arg7[%c2, %c0_40] : memref<4x64xf32, #tpu.memory_space<vmem>>, vector<1x64xf32>
    tpu.vector_store %arg7[%c2, %c0_40], %84 {strides = array<i32>} : memref<4x64xf32, #tpu.memory_space<vmem>>, vector<1x64xf32>,
    %86 = vector.extract_strided_slice %78 {offsets = [0, 192], sizes = [1, 64], strides = [1, 1]} : vector<1x256xf32> to vector<1x64xf32>
    %c3 = arith.constant 3 : index
    %c0_41 = arith.constant 0 : index
    %87 = vector.load %arg7[%c3, %c0_41] : memref<4x64xf32, #tpu.memory_space<vmem>>, vector<1x64xf32>
    tpu.vector_store %arg7[%c3, %c0_41], %86 {strides = array<i32>} : memref<4x64xf32, #tpu.memory_space<vmem>>, vector<1x64xf32>,
    %c1_42 = arith.constant 1 : index
    %88 = memref.load %arg0[%c1_42] : memref<4xi32, #tpu.memory_space<smem>>
    %c0_43 = arith.constant 0 : index
    %89 = memref.load %arg0[%c0_43] : memref<4xi32, #tpu.memory_space<smem>>
    %c1_i32 = arith.constant 1 : i32
    %90 = arith.addi %89, %c1_i32 : i32
    %91 = arith.cmpi eq, %88, %90 : i32
    %c2_44 = arith.constant 2 : index
    %92 = memref.load %arg0[%c2_44] : memref<4xi32, #tpu.memory_space<smem>>
    %c0_45 = arith.constant 0 : index
    %93 = memref.load %arg0[%c0_45] : memref<4xi32, #tpu.memory_space<smem>>
    %c2_i32 = arith.constant 2 : i32
    %94 = arith.addi %93, %c2_i32 : i32
    %95 = arith.cmpi eq, %92, %94 : i32
    %96 = arith.andi %91, %95 : i1
    %c3_46 = arith.constant 3 : index
    %97 = memref.load %arg0[%c3_46] : memref<4xi32, #tpu.memory_space<smem>>
    %c0_47 = arith.constant 0 : index
    %98 = memref.load %arg0[%c0_47] : memref<4xi32, #tpu.memory_space<smem>>
    %c3_i32 = arith.constant 3 : i32
    %99 = arith.addi %98, %c3_i32 : i32
    %100 = arith.cmpi eq, %97, %99 : i32
    %101 = arith.andi %96, %100 : i1
    %102 = arith.extui %101 : i1 to i32
    %c0_i32 = arith.constant 0 : i32
    %103 = arith.cmpi ne, %102, %c0_i32 : i32
    scf.if %103 {
      %c0_49 = arith.constant 0 : index
      %107 = memref.load %arg0[%c0_49] : memref<4xi32, #tpu.memory_space<smem>>
      %c0_i32_50 = arith.constant 0 : i32
      %c0_i32_51 = arith.constant 0 : i32
      %108 = tpu.memref_slice %arg6[%107, %c0_i32_51] : memref<64x64xf32, #tpu.memory_space<any>> -> memref<4x64xf32, #tpu.memory_space<any>>
      %109 = tpu.memref_slice %arg8[%c0_i32_50] : memref<4x!tpu.dma_semaphore, #tpu.memory_space<semaphore_mem>> -> memref<1x!tpu.dma_semaphore, #tpu.memory_space<semaphore_mem>>
      %110 = tpu.memref_squeeze %109 : memref<1x!tpu.dma_semaphore, #tpu.memory_space<semaphore_mem>> -> memref<!tpu.dma_semaphore, #tpu.memory_space<semaphore_mem>>
      tpu.enqueue_dma source(%arg7 : memref<4x64xf32, #tpu.memory_space<vmem>>) target(%108 : memref<4x64xf32, #tpu.memory_space<any>>) target_semaphore(%110 : memref<!tpu.dma_semaphore, #tpu.memory_space<semaphore_mem>>)
      %c0_i32_52 = arith.constant 0 : i32
      %c0_i32_53 = arith.constant 0 : i32
      %111 = tpu.memref_slice %arg6[%107, %c0_i32_53] : memref<64x64xf32, #tpu.memory_space<any>> -> memref<4x64xf32, #tpu.memory_space<any>>
      %112 = tpu.memref_slice %arg8[%c0_i32_52] : memref<4x!tpu.dma_semaphore, #tpu.memory_space<semaphore_mem>> -> memref<1x!tpu.dma_semaphore, #tpu.memory_space<semaphore_mem>>
      %113 = tpu.memref_squeeze %112 : memref<1x!tpu.dma_semaphore, #tpu.memory_space<semaphore_mem>> -> memref<!tpu.dma_semaphore, #tpu.memory_space<semaphore_mem>>
      tpu.wait_dma2 semaphore(%113 : memref<!tpu.dma_semaphore, #tpu.memory_space<semaphore_mem>>) src(%arg7 : memref<4x64xf32, #tpu.memory_space<vmem>>) dst(%111 : memref<4x64xf32, #tpu.memory_space<any>>)
    } else {
    }
    %true = arith.constant true
    %104 = arith.xori %101, %true : i1
    %105 = arith.extui %104 : i1 to i32
    %c0_i32_48 = arith.constant 0 : i32
    %106 = arith.cmpi ne, %105, %c0_i32_48 : i32
    scf.if %106 {
      %c0_49 = arith.constant 0 : index
      %107 = memref.load %arg0[%c0_49] : memref<4xi32, #tpu.memory_space<smem>>
      %c0_i32_50 = arith.constant 0 : i32
      %c0_i32_51 = arith.constant 0 : i32
      %c0_i32_52 = arith.constant 0 : i32
      %108 = tpu.memref_slice %arg7[%c0_i32_51, %c0_i32_52] : memref<4x64xf32, #tpu.memory_space<vmem>> -> memref<1x64xf32, #tpu.memory_space<vmem>>
      %c0_i32_53 = arith.constant 0 : i32
      %109 = tpu.memref_slice %arg6[%107, %c0_i32_53] : memref<64x64xf32, #tpu.memory_space<any>> -> memref<1x64xf32, #tpu.memory_space<any>>
      %110 = tpu.memref_slice %arg8[%c0_i32_50] : memref<4x!tpu.dma_semaphore, #tpu.memory_space<semaphore_mem>> -> memref<1x!tpu.dma_semaphore, #tpu.memory_space<semaphore_mem>>
      %111 = tpu.memref_squeeze %110 : memref<1x!tpu.dma_semaphore, #tpu.memory_space<semaphore_mem>> -> memref<!tpu.dma_semaphore, #tpu.memory_space<semaphore_mem>>
      tpu.enqueue_dma source(%108 : memref<1x64xf32, #tpu.memory_space<vmem>>) target(%109 : memref<1x64xf32, #tpu.memory_space<any>>) target_semaphore(%111 : memref<!tpu.dma_semaphore, #tpu.memory_space<semaphore_mem>>)
      %c1_54 = arith.constant 1 : index
      %112 = memref.load %arg0[%c1_54] : memref<4xi32, #tpu.memory_space<smem>>
      %c1_i32_55 = arith.constant 1 : i32
      %c1_i32_56 = arith.constant 1 : i32
      %c0_i32_57 = arith.constant 0 : i32
      %113 = tpu.memref_slice %arg7[%c1_i32_56, %c0_i32_57] : memref<4x64xf32, #tpu.memory_space<vmem>> -> memref<1x64xf32, #tpu.memory_space<vmem>>
      %c0_i32_58 = arith.constant 0 : i32
      %114 = tpu.memref_slice %arg6[%112, %c0_i32_58] : memref<64x64xf32, #tpu.memory_space<any>> -> memref<1x64xf32, #tpu.memory_space<any>>
      %115 = tpu.memref_slice %arg8[%c1_i32_55] : memref<4x!tpu.dma_semaphore, #tpu.memory_space<semaphore_mem>> -> memref<1x!tpu.dma_semaphore, #tpu.memory_space<semaphore_mem>>
      %116 = tpu.memref_squeeze %115 : memref<1x!tpu.dma_semaphore, #tpu.memory_space<semaphore_mem>> -> memref<!tpu.dma_semaphore, #tpu.memory_space<semaphore_mem>>
      tpu.enqueue_dma source(%113 : memref<1x64xf32, #tpu.memory_space<vmem>>) target(%114 : memref<1x64xf32, #tpu.memory_space<any>>) target_semaphore(%116 : memref<!tpu.dma_semaphore, #tpu.memory_space<semaphore_mem>>)
      %c2_59 = arith.constant 2 : index
      %117 = memref.load %arg0[%c2_59] : memref<4xi32, #tpu.memory_space<smem>>
      %c2_i32_60 = arith.constant 2 : i32
      %c2_i32_61 = arith.constant 2 : i32
      %c0_i32_62 = arith.constant 0 : i32
      %118 = tpu.memref_slice %arg7[%c2_i32_61, %c0_i32_62] : memref<4x64xf32, #tpu.memory_space<vmem>> -> memref<1x64xf32, #tpu.memory_space<vmem>>
      %c0_i32_63 = arith.constant 0 : i32
      %119 = tpu.memref_slice %arg6[%117, %c0_i32_63] : memref<64x64xf32, #tpu.memory_space<any>> -> memref<1x64xf32, #tpu.memory_space<any>>
      %120 = tpu.memref_slice %arg8[%c2_i32_60] : memref<4x!tpu.dma_semaphore, #tpu.memory_space<semaphore_mem>> -> memref<1x!tpu.dma_semaphore, #tpu.memory_space<semaphore_mem>>
      %121 = tpu.memref_squeeze %120 : memref<1x!tpu.dma_semaphore, #tpu.memory_space<semaphore_mem>> -> memref<!tpu.dma_semaphore, #tpu.memory_space<semaphore_mem>>
      tpu.enqueue_dma source(%118 : memref<1x64xf32, #tpu.memory_space<vmem>>) target(%119 : memref<1x64xf32, #tpu.memory_space<any>>) target_semaphore(%121 : memref<!tpu.dma_semaphore, #tpu.memory_space<semaphore_mem>>)
      %c3_64 = arith.constant 3 : index
      %122 = memref.load %arg0[%c3_64] : memref<4xi32, #tpu.memory_space<smem>>
      %c3_i32_65 = arith.constant 3 : i32
      %c3_i32_66 = arith.constant 3 : i32
      %c0_i32_67 = arith.constant 0 : i32
      %123 = tpu.memref_slice %arg7[%c3_i32_66, %c0_i32_67] : memref<4x64xf32, #tpu.memory_space<vmem>> -> memref<1x64xf32, #tpu.memory_space<vmem>>
      %c0_i32_68 = arith.constant 0 : i32
      %124 = tpu.memref_slice %arg6[%122, %c0_i32_68] : memref<64x64xf32, #tpu.memory_space<any>> -> memref<1x64xf32, #tpu.memory_space<any>>
      %125 = tpu.memref_slice %arg8[%c3_i32_65] : memref<4x!tpu.dma_semaphore, #tpu.memory_space<semaphore_mem>> -> memref<1x!tpu.dma_semaphore, #tpu.memory_space<semaphore_mem>>
      %126 = tpu.memref_squeeze %125 : memref<1x!tpu.dma_semaphore, #tpu.memory_space<semaphore_mem>> -> memref<!tpu.dma_semaphore, #tpu.memory_space<semaphore_mem>>
      tpu.enqueue_dma source(%123 : memref<1x64xf32, #tpu.memory_space<vmem>>) target(%124 : memref<1x64xf32, #tpu.memory_space<any>>) target_semaphore(%126 : memref<!tpu.dma_semaphore, #tpu.memory_space<semaphore_mem>>)
      %c0_69 = arith.constant 0 : index
      %127 = memref.load %arg0[%c0_69] : memref<4xi32, #tpu.memory_space<smem>>
      %c0_i32_70 = arith.constant 0 : i32
      %c0_i32_71 = arith.constant 0 : i32
      %c0_i32_72 = arith.constant 0 : i32
      %128 = tpu.memref_slice %arg7[%c0_i32_71, %c0_i32_72] : memref<4x64xf32, #tpu.memory_space<vmem>> -> memref<1x64xf32, #tpu.memory_space<vmem>>
      %c0_i32_73 = arith.constant 0 : i32
      %129 = tpu.memref_slice %arg6[%127, %c0_i32_73] : memref<64x64xf32, #tpu.memory_space<any>> -> memref<1x64xf32, #tpu.memory_space<any>>
      %130 = tpu.memref_slice %arg8[%c0_i32_70] : memref<4x!tpu.dma_semaphore, #tpu.memory_space<semaphore_mem>> -> memref<1x!tpu.dma_semaphore, #tpu.memory_space<semaphore_mem>>
      %131 = tpu.memref_squeeze %130 : memref<1x!tpu.dma_semaphore, #tpu.memory_space<semaphore_mem>> -> memref<!tpu.dma_semaphore, #tpu.memory_space<semaphore_mem>>
      tpu.wait_dma2 semaphore(%131 : memref<!tpu.dma_semaphore, #tpu.memory_space<semaphore_mem>>) src(%128 : memref<1x64xf32, #tpu.memory_space<vmem>>) dst(%129 : memref<1x64xf32, #tpu.memory_space<any>>)
      %c1_74 = arith.constant 1 : index
      %132 = memref.load %arg0[%c1_74] : memref<4xi32, #tpu.memory_space<smem>>
      %c1_i32_75 = arith.constant 1 : i32
      %c1_i32_76 = arith.constant 1 : i32
      %c0_i32_77 = arith.constant 0 : i32
      %133 = tpu.memref_slice %arg7[%c1_i32_76, %c0_i32_77] : memref<4x64xf32, #tpu.memory_space<vmem>> -> memref<1x64xf32, #tpu.memory_space<vmem>>
      %c0_i32_78 = arith.constant 0 : i32
      %134 = tpu.memref_slice %arg6[%132, %c0_i32_78] : memref<64x64xf32, #tpu.memory_space<any>> -> memref<1x64xf32, #tpu.memory_space<any>>
      %135 = tpu.memref_slice %arg8[%c1_i32_75] : memref<4x!tpu.dma_semaphore, #tpu.memory_space<semaphore_mem>> -> memref<1x!tpu.dma_semaphore, #tpu.memory_space<semaphore_mem>>
      %136 = tpu.memref_squeeze %135 : memref<1x!tpu.dma_semaphore, #tpu.memory_space<semaphore_mem>> -> memref<!tpu.dma_semaphore, #tpu.memory_space<semaphore_mem>>
      tpu.wait_dma2 semaphore(%136 : memref<!tpu.dma_semaphore, #tpu.memory_space<semaphore_mem>>) src(%133 : memref<1x64xf32, #tpu.memory_space<vmem>>) dst(%134 : memref<1x64xf32, #tpu.memory_space<any>>)
      %c2_79 = arith.constant 2 : index
      %137 = memref.load %arg0[%c2_79] : memref<4xi32, #tpu.memory_space<smem>>
      %c2_i32_80 = arith.constant 2 : i32
      %c2_i32_81 = arith.constant 2 : i32
      %c0_i32_82 = arith.constant 0 : i32
      %138 = tpu.memref_slice %arg7[%c2_i32_81, %c0_i32_82] : memref<4x64xf32, #tpu.memory_space<vmem>> -> memref<1x64xf32, #tpu.memory_space<vmem>>
      %c0_i32_83 = arith.constant 0 : i32
      %139 = tpu.memref_slice %arg6[%137, %c0_i32_83] : memref<64x64xf32, #tpu.memory_space<any>> -> memref<1x64xf32, #tpu.memory_space<any>>
      %140 = tpu.memref_slice %arg8[%c2_i32_80] : memref<4x!tpu.dma_semaphore, #tpu.memory_space<semaphore_mem>> -> memref<1x!tpu.dma_semaphore, #tpu.memory_space<semaphore_mem>>
      %141 = tpu.memref_squeeze %140 : memref<1x!tpu.dma_semaphore, #tpu.memory_space<semaphore_mem>> -> memref<!tpu.dma_semaphore, #tpu.memory_space<semaphore_mem>>
      tpu.wait_dma2 semaphore(%141 : memref<!tpu.dma_semaphore, #tpu.memory_space<semaphore_mem>>) src(%138 : memref<1x64xf32, #tpu.memory_space<vmem>>) dst(%139 : memref<1x64xf32, #tpu.memory_space<any>>)
      %c3_84 = arith.constant 3 : index
      %142 = memref.load %arg0[%c3_84] : memref<4xi32, #tpu.memory_space<smem>>
      %c3_i32_85 = arith.constant 3 : i32
      %c3_i32_86 = arith.constant 3 : i32
      %c0_i32_87 = arith.constant 0 : i32
      %143 = tpu.memref_slice %arg7[%c3_i32_86, %c0_i32_87] : memref<4x64xf32, #tpu.memory_space<vmem>> -> memref<1x64xf32, #tpu.memory_space<vmem>>
      %c0_i32_88 = arith.constant 0 : i32
      %144 = tpu.memref_slice %arg6[%142, %c0_i32_88] : memref<64x64xf32, #tpu.memory_space<any>> -> memref<1x64xf32, #tpu.memory_space<any>>
      %145 = tpu.memref_slice %arg8[%c3_i32_85] : memref<4x!tpu.dma_semaphore, #tpu.memory_space<semaphore_mem>> -> memref<1x!tpu.dma_semaphore, #tpu.memory_space<semaphore_mem>>
      %146 = tpu.memref_squeeze %145 : memref<1x!tpu.dma_semaphore, #tpu.memory_space<semaphore_mem>> -> memref<!tpu.dma_semaphore, #tpu.memory_space<semaphore_mem>>
      tpu.wait_dma2 semaphore(%146 : memref<!tpu.dma_semaphore, #tpu.memory_space<semaphore_mem>>) src(%143 : memref<1x64xf32, #tpu.memory_space<vmem>>) dst(%144 : memref<1x64xf32, #tpu.memory_space<any>>)
    } else {
    }
    return
  }
}

</mosaic_0001>

<bundles_post_ra>
// kernel: clip_vision_adapter_forward.1
= control target key start
LH: loop header
LB: loop body
LE: loop exit
PB: predicated region body
PF: predicated region fallthrough
CT: control target
= control target key end

     0   :  { %12 = vsyncpa [#allocation6], 0  ;;  %s1374_s0 = inlined_call_operand.vmem [shape: s32[4], index: 0, kind: input, shape index: {}]   ;;  %s1375_s1 = inlined_call_operand.vmem [shape: f32[1,32], index: 1, kind: input, shape index: {}]   ;;  %s1376_s2 = inlined_call_operand.hbm [shape: bf16[128,640], index: 2, kind: input, shape index: {}]   ;;  %s1377_s3 = inlined_call_operand.vmem [shape: f32[1,640], index: 3, kind: input, shape index: {}]   ;;  %s1378_s4 = inlined_call_operand.hbm [shape: f32[64,64], index: 4, kind: input, shape index: {}, may-alias: {4,6}]   ;;  %s1379_s5 = inlined_call_operand.vmem [shape: f32[1,256], index: 5, kind: output, shape index: {0}]   ;;  %s1380_s6 = inlined_call_operand.hbm [shape: f32[64,64], index: 6, kind: output, shape index: {1}, may-alias: {4,6}]  }
   0x1   :  { %s20_s23 = sshll.u32 %s1374_s0, 4  ;;  %s21_s23 = int_to_ptr.vmem [resolvable:$true] %s20_s23 }
   0x2   :  { %13 = vsyncpa [#allocation5], 0  ;;  %s902_s24 = scalar_lea.vmem %s21_s23, 16  ;;  %p907_p1 = scmp.lt.s32.totalorder %s21_s23, %s21_s23 }
   0x3   :  { %p903_p0 = scmp.ne.s32.totalorder %s21_s23, %s902_s24  ;;  %p908_p2 = scmp.lt.s32.totalorder %s902_s24, %s902_s24 }
   0x5   :  { %p909_p3 = por %p908_p2, %p907_p1 }
   0x7   :  { %p910_p4 = pnand %p909_p3, %p903_p0 }
   0x9   :  { %913 = shalt.err (!%p910_p4)
}
   0xa   :  { %s1102_s4 = smov [#allocation4]   ;;  %s1103_s25 = smov [#allocation7]  }
   0xb   :  { %23 = dma.vmem_to_smem %s21_s23, 16, %s1102_s4, [#allocation6]  }
   0xc   :  { %s31_s26 = sshll.u32 %s1103_s25, 4  ;;  %s914_s29 = scalar_lea.hbm %s1376_s2, 5120  ;;  %s32_s26 = int_to_ptr.vmem [resolvable:$true] %s31_s26 }
   0xd   :  { %p915_p5 = scmp.ne.s32.totalorder %s1376_s2, %s914_s29  ;;  %p918_p6 = scmp.lt.u32.totalorder %s914_s29, %s1376_s2 }
   0xf   :  { %p920_p7 = pnand %p918_p6, %p915_p5 }
  0x11   :  { %923 = shalt.err (!%p920_p7)
}
  0x12   :  { %s924_s9 = scalar_lea.vmem %s32_s26, 5120  ;;  %p929_p9 = scmp.lt.s32.totalorder %s32_s26, %s32_s26 }
  0x13   :  { %p925_p8 = scmp.ne.s32.totalorder %s32_s26, %s924_s9  ;;  %p930_p10 = scmp.lt.s32.totalorder %s924_s9, %s924_s9 }
  0x15   :  { %p931_p11 = por %p930_p10, %p929_p9 }
  0x17   :  { %p932_p12 = pnand %p931_p11, %p925_p8 }
  0x19   :  { %935 = shalt.err (!%p932_p12)
}
  0x1a   :  { %s1104_s10 = smov 320   ;;  %s1105_s11 = smov 20  }
  0x1b   :  { %37 = dma.hbm_to_vmem [thread:$0]  %s1376_s2, 5120, %s32_s26, [#allocation5], %s1104_s10, %s1104_s10, %s1105_s11  }
  0x1c   :  { %1078 = dma.done.wait [#allocation6], 16  }
  0x1d   :  { %1079 = vsyncadd [#allocation6], 4294967280 }
  0x1e   :  { %1080 = dma.done.wait [#allocation5], 5120  }
  0x1f   :  { %1081 = vsyncadd [#allocation5], 4294962176 }
  0x20   :  { %46 = sfence }
  0x21   :  { %v48_v0 = vld [vmem:[%s1375_s1] sm:$0x1]  ;;  %vm49_vm0 = vcmask 253952   ;;  %v852_v7 = vld [vmem:[#allocation7] ss:$20 sps:$4 sm:$0xff]   ;;  %v1106_v8 = vmov 0.0  }
  0x22   :  { %v50_v1 = vsel %vm49_vm0, %v48_v0, 0.0  ;;  %780 = vmatprep.subr.bf16.mxu0 %v1106_v8  ;;  %vm1107_vm1 = vmmov 0   ;;  %v853_v9 = vld [vmem:[#allocation7 + $0x28] ss:$20 sps:$4 sm:$0xff]   ;;  %788 = vmatprep.subr.bf16.mxu1 %v1106_v8  ;;  %v854_v10 = vld [vmem:[#allocation7 + $0x4] ss:$20 sps:$4 sm:$0xff]  }
  0x23   :  { %51 = vadd.xlane.f32.xlu0 %v50_v1  ;;  %784 = vmatprep.mubr.msk.bf16.mxu0 %vm1107_vm1, %v1106_v8  ;;  %vm82_vm2 = vcmask 261120   ;;  %v855_v17 = vld [vmem:[#allocation7 + $0x2c] ss:$20 sps:$4 sm:$0xff]   ;;  %v856_v18 = vld [vmem:[#allocation7 + $0x54] ss:$20 sps:$4 sm:$0xff]   ;;  %vm241_vm3 = vcmask 1040384  }
  0x24   :  { %781 = vmatpush3.bf16.msra.mxu0 %v852_v7  ;;  %804 = vmatprep.mubr.msk.bf16.mxu1 %vm1107_vm1, %v1106_v8  ;;  %v857_v19 = vld [vmem:[#allocation7 + $0x7c] ss:$20 sps:$4 sm:$0xff]   ;;  %v858_v20 = vld [vmem:[#allocation7 + $0xa4] ss:$20 sps:$4 sm:$0xff]   ;;  %v859_v21 = vld [vmem:[#allocation7 + $0xcc] ss:$20 sps:$4 sm:$0xff]  }
  0x25   :  { %782 = vmatprep.subr.bf16.mxu0 %v1106_v8  ;;  %789 = vmatpush3.bf16.msra.mxu1 %v854_v10  ;;  %v860_v22 = vld [vmem:[#allocation7 + $0xf4] ss:$20 sps:$4 sm:$0xff]   ;;  %v861_v23 = vld [vmem:[#allocation7 + $0x11c] ss:$20 sps:$4 sm:$0xff]   ;;  %v864_v49 = vld [vmem:[#allocation7 + $0x58] ss:$20 sps:$4 sm:$0xff]  }
  0x26   :  { %790 = vmatprep.subr.bf16.mxu1 %v1106_v8  ;;  %v68_v24 = vld [vmem:[%s1377_s3] sm:$0x1]  ;;  %v151_v40 = vld [vmem:[%s1377_s3 + $0x1] sm:$0x1]  ;;  %v863_v48 = vld [vmem:[#allocation7 + $0x30] ss:$20 sps:$4 sm:$0xff]  }
  0x27   :  { %v862_v47 = vld [vmem:[#allocation7 + $0x8] ss:$20 sps:$4 sm:$0xff]   ;;  %v865_v55 = vld [vmem:[#allocation7 + $0x80] ss:$20 sps:$4 sm:$0xff]   ;;  %v867_v57 = vld [vmem:[#allocation7 + $0xd0] ss:$20 sps:$4 sm:$0xff]  }
  0x28   :  { %783 = vmatpush3.bf16.msra.mxu0 %v853_v9  ;;  %v866_v56 = vld [vmem:[#allocation7 + $0xa8] ss:$20 sps:$4 sm:$0xff]   ;;  %v868_v58 = vld [vmem:[#allocation7 + $0xf8] ss:$20 sps:$4 sm:$0xff]   ;;  %v869_v59 = vld [vmem:[#allocation7 + $0x120] ss:$20 sps:$4 sm:$0xff]  }
  0x29   :  { %808 = vmatprep.subr.bf16.mxu0 %v1106_v8  ;;  %791 = vmatpush3.bf16.msra.mxu1 %v855_v17  ;;  %v870_v60 = vld [vmem:[#allocation7 + $0xc] ss:$20 sps:$4 sm:$0xff]   ;;  %v872_v61 = vld [vmem:[#allocation7 + $0x10] ss:$20 sps:$4 sm:$0xff]   ;;  %v893_v17 = vld [vmem:[#allocation7 + $0x128] ss:$20 sps:$4 sm:$0xff]  }
  0x2a   :  { %792 = vmatprep.subr.bf16.mxu1 %v1106_v8  ;;  %v876_v7 = vld [vmem:[#allocation7 + $0x5c] ss:$20 sps:$4 sm:$0xff]   ;;  %v879_v9 = vld [vmem:[#allocation7 + $0x84] ss:$20 sps:$4 sm:$0xff]   ;;  %s1203_s20 = sld [smem:[#allocation4]]  ;;  %s744_s21 = sld [smem:[#allocation4 + $0x1]] }
  0x2b   :  { %v884_v10 = vld [vmem:[#allocation7 + $0xb0] ss:$20 sps:$4 sm:$0xff]   ;;  %s745_s22 = sld [smem:[#allocation4 + $0x2]]  ;;  %s746_s23 = sld [smem:[#allocation4 + $0x3]]  ;;  %vm544_vm4 = vcmask 516096  }
  0x2c   :  { %s1110_s29 = smov 64   ;;  %s1111_s7 = smov [#allocation2]  }
  0x2d   :  { %793 = vmatpush3.bf16.msra.mxu1 %v856_v18  ;;  %v891_v18 = vld [vmem:[#allocation7 + $0x124] ss:$20 sps:$4 sm:$0xff]   ;;  %s581_s8 = sshll.u32 %s1111_s7, 4  ;;  %s1224_s8 = int_to_ptr.vmem [resolvable:$true] %s581_s8 }
  0x2e   :  { %794 = vmatprep.subr.bf16.mxu1 %v1106_v8  ;;  %p944_p9 = scmp.lt.s32.totalorder %s1224_s8, %s1224_s8 }
  0x30   :  { %s557_s24 = sadd.s32 1, %s1203_s20  ;;  %s560_s4 = sadd.s32 2, %s1203_s20 }
  0x31   :  { %795 = vmatpush3.bf16.msra.mxu1 %v857_v19  ;;  %v272_v19 = vld [vmem:[%s1377_s3 + $0x2] sm:$0x1]  ;;  %p558_p13 = scmp.eq.s32.totalorder %s744_s21, %s557_s24  ;;  %p561_p0 = scmp.eq.s32.totalorder %s745_s22, %s560_s4 }
  0x32   :  { %796 = vmatprep.subr.bf16.mxu1 %v1106_v8  ;;  %s565_s25 = sadd.s32 3, %s1203_s20  ;;  %s747_s0 = sshll.u32 %s1203_s20, 4 }
  0x33   :  { %p562_p1 = pnand %p561_p0, %p558_p13  ;;  %p566_p3 = scmp.eq.s32.totalorder %s746_s23, %s565_s25 }
  0x34   :  { %s573_s11 = scalar_lea.hbm %s1380_s6, %s747_s0 }
  0x35   :  { %797 = vmatpush3.bf16.msra.mxu1 %v858_v20  ;;  %p563_p2 = pneg %p562_p1 }
  0x36   :  { %798 = vmatprep.subr.bf16.mxu1 %v1106_v8 }
  0x37   :  { %p1208_p4 = pnand %p566_p3, %p563_p2 }
  0x39   :  { %799 = vmatpush3.bf16.msra.mxu1 %v859_v21  ;;  %p938_p6 = pneg %p1208_p4 }
  0x3a   :  { %800 = vmatprep.subr.bf16.mxu1 %v1106_v8 }
  0x3d   :  { %801 = vmatpush3.bf16.msra.mxu1 %v860_v22 }
  0x3e   :  { %802 = vmatprep.subr.bf16.mxu1 %v1106_v8 }
  0x41   :  { %803 = vmatpush3.bf16.msra.mxu1 %v861_v23 }
  0x42   :  { %480 = vmatprep.subr.bf16.mxu1 %v872_v61 }
  0xb0   :  { %v52_v2 = vpop.xlane.xlu0 %51 }
  0xb1   :  { %v54_v3 = vmul.f32 0.03125, %v52_v2 }
  0xb3   :  { %v55_v4 = vsub.f32 %v48_v0, %v54_v3 }
  0xb5   :  { %v56_v5 = vmul.f32 %v55_v4, %v55_v4 }
  0xb7   :  { %v57_v6 = vsel %vm49_vm0, %v56_v5, 0.0  ;;  %v873_v5 = vld [vmem:[#allocation7 + $0x34] ss:$20 sps:$4 sm:$0xff]  }
  0xb8   :  { %58 = vadd.xlane.f32.xlu0 %v57_v6  ;;  %v878_v6 = vld [vmem:[#allocation7 + $0x60] ss:$20 sps:$4 sm:$0xff]  }
 0x145   :  { %v59_v11 = vpop.xlane.xlu0 %58 }
 0x146   :  { %v60_v12 = vmul.f32 0.03125, %v59_v11  ;;  %v882_v11 = vld [vmem:[#allocation7 + $0xac] ss:$20 sps:$4 sm:$0xff]  }
 0x148   :  { %v61_v13 = vadd.f32 1e-05, %v60_v12  ;;  %v887_v12 = vld [vmem:[#allocation7 + $0xd8] ss:$20 sps:$4 sm:$0xff]  }
 0x14a   :  { %894 = vrsqrt.f32 %v61_v13  ;;  %v1108_v13 = vmov 0  }
 0x154   :  { %v895_v14 = vpop.eup %894 }
 0x155   :  { %v63_v15 = vmul.f32 %v895_v14, %v55_v4  ;;  %v875_v4 = vld [vmem:[#allocation7 + $0x38] ss:$20 sps:$4 sm:$0xff]   ;;  %v885_v14 = vld [vmem:[#allocation7 + $0xd4] ss:$20 sps:$4 sm:$0xff]  }
 0x157   :  { %v69_v16 = vpack.c.bf16 %v63_v15, %v63_v15  ;;  %v890_v15 = vld [vmem:[#allocation7 + $0x100] ss:$20 sps:$4 sm:$0xff]  }
 0x159   :  { %785 = vmatmul.mubr.msk.bf16.vlgmr.msra.gmra.mrb[0].mxu0 %vm82_vm2, %v69_v16  ;;  %v888_v16 = vld [vmem:[#allocation7 + $0xfc] ss:$20 sps:$4 sm:$0xff]  }
 0x15a   :  { %824 = vmatprep.mubr.msk.bf16.mxu0 %vm1107_vm1, %v1106_v8  ;;  %809 = vmatpush3.bf16.msra.mxu0 %v862_v47 }
 0x15b   :  { %810 = vmatprep.subr.bf16.mxu0 %v1106_v8 }
 0x15e   :  { %811 = vmatpush3.bf16.msra.mxu0 %v863_v48 }
 0x15f   :  { %812 = vmatprep.subr.bf16.mxu0 %v1106_v8 }
 0x162   :  { %813 = vmatpush3.bf16.msra.mxu0 %v864_v49 }
 0x163   :  { %814 = vmatprep.subr.bf16.mxu0 %v1106_v8 }
 0x166   :  { %815 = vmatpush3.bf16.msra.mxu0 %v865_v55 }
 0x167   :  { %816 = vmatprep.subr.bf16.mxu0 %v1106_v8 }
 0x16a   :  { %817 = vmatpush3.bf16.msra.mxu0 %v866_v56 }
 0x16b   :  { %818 = vmatprep.subr.bf16.mxu0 %v1106_v8 }
 0x16e   :  { %819 = vmatpush3.bf16.msra.mxu0 %v867_v57 }
 0x16f   :  { %820 = vmatprep.subr.bf16.mxu0 %v1106_v8 }
 0x172   :  { %821 = vmatpush3.bf16.msra.mxu0 %v868_v58 }
 0x173   :  { %822 = vmatprep.subr.bf16.mxu0 %v1106_v8  ;;  %v881_v8 = vld [vmem:[#allocation7 + $0x88] ss:$20 sps:$4 sm:$0xff]  }
 0x176   :  { %823 = vmatpush3.bf16.msra.mxu0 %v869_v59 }
 0x22c   :  { %v120_v25 = vpop.f32.mrb[0].mxu0 }
 0x22d   :  { %v121_v26 = vadd.f32 %v120_v25, %v68_v24  ;;  %v786_v27 = vpop.f32.mrb[1].mxu0 }
 0x22e   :  { %v123_v28 = vpop.f32.mrb[2].mxu0 }
 0x22f   :  { %v127_v29 = vmul.f32 0.044715, %v121_v26  ;;  %v787_v30 = vpop.f32.mrb[3].mxu0  ;;  %v126_v36 = vmul.f32 0.5, %v121_v26 }
 0x231   :  { %v128_v31 = vmul.f32 %v127_v29, %v121_v26 }
 0x233   :  { %v129_v32 = vmul.f32 %v128_v31, %v121_v26 }
 0x235   :  { %v130_v33 = vadd.f32 %v129_v32, %v121_v26 }
 0x237   :  { %v131_v34 = vmul.f32 0.7978846, %v130_v33 }
 0x239   :  { %896 = vtanh.f32 %v131_v34 }
 0x243   :  { %v897_v35 = vpop.eup %896 }
 0x244   :  { %v133_v37 = vadd.f32 1.0, %v897_v35  ;;  %v470_v35 = vlaneseq }
 0x246   :  { %v134_v38 = vmul.f32 %v133_v37, %v126_v36  ;;  %v471_v36 = vshrl.u32 %v470_v35, 7  ;;  %vm541_vm5 = vcmp.lt.s32.totalorder %v470_v35, 256 }
 0x248   :  { %v152_v39 = vpack.c.bf16 %v134_v38, %v134_v38  ;;  %v472_v37 = vsub.s32 0, %v471_v36  ;;  %v387_v38 = vld [vmem:[%s1377_s3 + $0x3] sm:$0x3] }
 0x24a   :  { %805 = vmatmul.mubr.bf16.vlgmr.msra.gmra.mrb[0].mxu1 %v152_v39  ;;  %v476_v39 = vsub.s32 1, %v471_v36 }
 0x24b   :  { %481 = vmatpush1.bf16.msra.mxu1 %v870_v60  ;;  %512 = vmatprep.mubr.bf16.mxu1 %v1108_v13 }
 0x24c   :  { %482 = vmatprep.subr.bf16.mxu1 %v875_v4 }
 0x24f   :  { %483 = vmatpush1.bf16.msra.mxu1 %v873_v5 }
 0x250   :  { %484 = vmatprep.subr.bf16.mxu1 %v878_v6 }
 0x253   :  { %485 = vmatpush1.bf16.msra.mxu1 %v876_v7 }
 0x254   :  { %486 = vmatprep.subr.bf16.mxu1 %v881_v8 }
 0x257   :  { %487 = vmatpush1.bf16.msra.mxu1 %v879_v9 }
 0x258   :  { %488 = vmatprep.subr.bf16.mxu1 %v884_v10 }
 0x25b   :  { %489 = vmatpush1.bf16.msra.mxu1 %v882_v11 }
 0x25c   :  { %490 = vmatprep.subr.bf16.mxu1 %v887_v12 }
 0x25f   :  { %491 = vmatpush1.bf16.msra.mxu1 %v885_v14 }
 0x260   :  { %492 = vmatprep.subr.bf16.mxu1 %v890_v15 }
 0x263   :  { %493 = vmatpush1.bf16.msra.mxu1 %v888_v16 }
 0x264   :  { %494 = vmatprep.subr.bf16.mxu1 %v893_v17 }
 0x267   :  { %495 = vmatpush1.bf16.msra.mxu1 %v891_v18 }
 0x31d   :  { %v235_v41 = vpop.f32.mrb[0].mxu1 }
 0x31e   :  { %v236_v42 = vadd.f32 %v235_v41, %v151_v40  ;;  %v806_v43 = vpop.f32.mrb[1].mxu1  ;;  %v1109_v40 = vmov 1966171168  }
 0x31f   :  { %v238_v44 = vpop.f32.mrb[2].mxu1  ;;  %v525_v41 = vunpack.c.l.s4 %v1109_v40  ;;  %v477_v43 = vrot.slane %v387_v38, %v476_v39 }
 0x320   :  { %v807_v45 = vpop.f32.mrb[3].mxu1  ;;  %v242_v46 = vsel %vm241_vm3, %v236_v42, 0.0 }
 0x321   :  { %243 = vadd.xlane.f32.xlu1 %v242_v46  ;;  %v526_v44 = vunpack.c.0.s8 %v525_v41 }
 0x323   :  { %v529_v49 = vsub.s32 %v526_v44, %v471_v36 }
 0x3ae   :  { %v244_v50 = vpop.xlane.xlu1 %243 }
 0x3af   :  { %v246_v51 = vmul.f32 0.0078125, %v244_v50 }
 0x3b1   :  { %v247_v52 = vsub.f32 %v236_v42, %v246_v51  ;;  %v473_v42 = vrot.slane %v387_v38, %v472_v37 }
 0x3b3   :  { %v248_v53 = vmul.f32 %v247_v52, %v247_v52 }
 0x3b5   :  { %v249_v54 = vsel %vm241_vm3, %v248_v53, 0.0 }
 0x3b6   :  { %250 = vadd.xlane.f32.xlu1 %v249_v54 }
 0x443   :  { %v251_v62 = vpop.xlane.xlu1 %250 }
 0x444   :  { %v252_v63 = vmul.f32 0.0078125, %v251_v62 }
 0x446   :  { %v253_v0 = vadd.f32 1e-05, %v252_v63 }
 0x448   :  { %898 = vrsqrt.f32 %v253_v0 }
 0x452   :  { %v899_v1 = vpop.eup %898 }
 0x453   :  { %v255_v2 = vmul.f32 %v899_v1, %v247_v52 }
 0x455   :  { %v273_v3 = vpack.c.bf16 %v255_v2, %v255_v2 }
 0x457   :  { %825 = vmatmul.mubr.bf16.vlgmr.msra.gmra.mrb[4].mxu0 %v273_v3 }
 0x52a   :  { %v356_v20 = vpop.f32.mrb[4].mxu0 }
 0x52b   :  { %v357_v21 = vadd.f32 %v356_v20, %v272_v19  ;;  %v826_v22 = vpop.f32.mrb[5].mxu0 }
 0x52c   :  { %v359_v23 = vpop.f32.mrb[6].mxu0 }
 0x52d   :  { %v363_v24 = vmul.f32 0.044715, %v357_v21  ;;  %v827_v25 = vpop.f32.mrb[7].mxu0  ;;  %v362_v31 = vmul.f32 0.5, %v357_v21 }
 0x52f   :  { %v364_v26 = vmul.f32 %v363_v24, %v357_v21 }
 0x531   :  { %v365_v27 = vmul.f32 %v364_v26, %v357_v21 }
 0x533   :  { %v366_v28 = vadd.f32 %v365_v27, %v357_v21 }
 0x535   :  { %v367_v29 = vmul.f32 0.7978846, %v366_v28 }
 0x537   :  { %900 = vtanh.f32 %v367_v29 }
 0x541   :  { %v901_v30 = vpop.eup %900 }
 0x542   :  { %v369_v32 = vadd.f32 1.0, %v901_v30 }
 0x544   :  { %v370_v33 = vmul.f32 %v369_v32, %v362_v31 }
 0x546   :  { %v388_v34 = vpack.c.bf16 %v370_v33, %v370_v33 }
 0x548   :  { %513 = vmatmul.mubr.bf16.vlgmr.msra.gmra.mrb[4].mxu1 %v388_v34 }
 0x61b   :  { %v514_v45 = vpop.f32.mrb[4].mxu1 }
 0x61c   :  { %v515_v46 = vadd.f32 %v514_v45, %v473_v42  ;;  %v516_v47 = vpop.f32.mrb[5].mxu1 }
 0x61d   :  { %v517_v48 = vadd.f32 %v516_v47, %v477_v43  ;;  %v518_v50 = vpop.f32.mrb[6].mxu1 }
 0x61e   :  { %v519_v51 = vpop.f32.mrb[7].mxu1  ;;  %546 = vrot.lane.b32.xlu0 %v515_v46, %s1110_s29  ;;  %545 = vst.msk [vmem:[#allocation2] sm:$0x1] %vm544_vm4, %v515_v46 }
 0x61f   :  { %v523_v52 = vcombine.low %v515_v46, %v517_v48  ;;  %551 = vrot.lane.b32.xlu1 %v517_v48, %s1110_s29  ;;  %550 = vst.msk [vmem:[#allocation2 + $0x2] sm:$0x1] %vm544_vm4, %v517_v48 }
 0x621   :  { %v530_v53 = vrot.slane %v523_v52, %v529_v49 }
 0x623   :  { %v537_v54 = vrot.slane %v530_v53, %v529_v49 }
 0x625   :  { %543 = vst.msk [vmem:[%s1379_s5] sm:$0x3] %vm541_vm5, %v537_v54  ;;  %s1229_s5 = scalar_lea.vmem %s1224_s8, 64 }
 0x626   :  { %p937_p5 = scmp.ne.s32.totalorder %s1224_s8, %s1229_s5  ;;  %p945_p10 = scmp.lt.s32.totalorder %s1229_s5, %s1229_s5 }
 0x628   :  { %p939_p7 = pnand %p938_p6, %p937_p5  ;;  %p946_p11 = por %p945_p10, %p944_p9 }
 0x62a   :  { %p940_p8 = pneg %p939_p7 }
 0x62c   :  { %p947_p12 = pnand %p946_p11, %p940_p8 }
 0x690   :  { %v547_v55 = vpop.permute.xlu0 %546 }
 0x691   :  { %549 = vst.msk [vmem:[#allocation2 + $0x1] sm:$0x1] %vm544_vm4, %v547_v55  ;;  %v552_v56 = vpop.permute.xlu1 %551 }
 0x692   :  { %554 = vst.msk [vmem:[#allocation2 + $0x3] sm:$0x1] %vm544_vm4, %v552_v56 }
 0x693   :  { %950 = shalt.err (!%p947_p12)  }
 0x694   :  { %s951_s12 = scalar_lea.hbm %s573_s11, 64  ;;  %s1245_s15 = scalar_lea.hbm %s1380_s6, 1024 }
 0x695   :  { %p952_p13 = scmp.ne.s32.totalorder %s573_s11, %s951_s12  ;;  %p957_p2 = scmp.lt.u32.totalorder %s573_s11, %s1380_s6 }
 0x696   :  { %p958_p3 = scmp.lt.u32.totalorder %s1245_s15, %s951_s12  ;;  %p960_p7 = scmp.lt.u32.totalorder %s951_s12, %s573_s11 }
 0x697   :  { %p954_p0 = pnand %p952_p13, %p938_p6 }
 0x698   :  { %p959_p5 = por %p958_p3, %p957_p2 }
 0x699   :  { %p955_p1 = pneg %p954_p0 }
 0x69a   :  { %p961_p10 = por %p960_p7, %p959_p5 }
 0x69c   :  { %p962_p8 = pnand %p961_p10, %p955_p1 }
 0x69e   :  { %965 = shalt.err (!%p962_p8)  }
 0x69f   :  { %829 = dma.vmem_to_hbm [thread:$0]  (!%p1208_p4), %s1224_s8, 64, %s573_s11, [#allocation3] }
 0x6a0   :  { %1083 = dma.done.wait (!%p1208_p4), [#allocation3], 64 }
 0x6a1   :  { %1085 = vsyncadd (!%p1208_p4), [#allocation3], 4294967232  ;;  %s591_s16 = sld [smem:[#allocation4]]  ;;  %s749_s17 = sld [smem:[#allocation4 + $0x1]] }
 0x6a2   :  { %s1112_s18 = smov [#allocation2 + $0x1]   ;;  %s1258_s20 = sld [smem:[#allocation4 + $0x2]] }
 0x6a3   :  { %s617_s19 = sshll.u32 %s1112_s18, 4  ;;  %s1113_s21 = smov [#allocation2 + $0x2]   ;;  %s1262_s19 = int_to_ptr.vmem [resolvable:$true] %s617_s19 }
 0x6a4   :  { %s633_s22 = sshll.u32 %s1113_s21, 4  ;;  %s1260_s23 = sld [smem:[#allocation4 + $0x3]]  ;;  %s1264_s22 = int_to_ptr.vmem [resolvable:$true] %s633_s22 }
 0x6a5   :  { %s1114_s24 = smov [#allocation2 + $0x3]   ;;  %s966_s9 = scalar_lea.vmem %s1224_s8, 16 }
 0x6a6   :  { %s1266_s4 = sshll.u32 %s1114_s24, 4  ;;  %p967_p6 = scmp.ne.s32.totalorder %s1224_s8, %s966_s9  ;;  %s650_s4 = int_to_ptr.vmem [resolvable:$true] %s1266_s4 }
 0x6a7   :  { %s748_s25 = sshll.u32 %s591_s16, 4  ;;  %s750_s27 = sshll.u32 %s749_s17, 4 }
 0x6a8   :  { %s593_s3 = scalar_lea.hbm %s1380_s6, %s748_s25  ;;  %s1274_s7 = scalar_lea.hbm %s1380_s6, %s750_s27 }
 0x6a9   :  { %p968_p11 = pnand %p967_p6, %p1208_p4  ;;  %p974_p13 = scmp.lt.s32.totalorder %s1229_s5, %s966_s9 }
 0x6ab   :  { %p969_p12 = pneg %p968_p11  ;;  %p975_p0 = por %p974_p13, %p944_p9 }
 0x6ad   :  { %p976_p1 = pnand %p975_p0, %p969_p12 }
 0x6af   :  { %979 = shalt.err (!%p976_p1)  }
 0x6b0   :  { %s980_s10 = scalar_lea.hbm %s593_s3, 16  ;;  %p985_p7 = scmp.lt.u32.totalorder %s593_s3, %s1380_s6 }
 0x6b1   :  { %p981_p2 = scmp.ne.s32.totalorder %s593_s3, %s980_s10  ;;  %p986_p10 = scmp.lt.u32.totalorder %s1245_s15, %s980_s10 }
 0x6b2   :  { %p988_p6 = scmp.lt.u32.totalorder %s980_s10, %s593_s3 }
 0x6b3   :  { %p982_p3 = pnand %p981_p2, %p1208_p4  ;;  %p987_p8 = por %p986_p10, %p985_p7 }
 0x6b5   :  { %p983_p5 = pneg %p982_p3  ;;  %p989_p11 = por %p988_p6, %p987_p8 }
 0x6b7   :  { %p990_p9 = pnand %p989_p11, %p983_p5 }
 0x6b9   :  { %993 = shalt.err (!%p990_p9)  }
 0x6ba   :  { %831 = dma.vmem_to_hbm [thread:$0]  (%p1208_p4), %s1224_s8, 16, %s593_s3, [#allocation3] }
 0x6bb   :  { %s994_s13 = scalar_lea.vmem %s1262_s19, 16  ;;  %p1001_p1 = scmp.lt.s32.totalorder %s1262_s19, %s1224_s8 }
 0x6bc   :  { %p995_p12 = scmp.ne.s32.totalorder %s1262_s19, %s994_s13  ;;  %p1002_p2 = scmp.lt.s32.totalorder %s1229_s5, %s994_s13 }
 0x6be   :  { %p996_p13 = pnand %p995_p12, %p1208_p4  ;;  %p1003_p3 = por %p1002_p2, %p1001_p1 }
 0x6c0   :  { %p997_p0 = pneg %p996_p13 }
 0x6c2   :  { %p1004_p5 = pnand %p1003_p3, %p997_p0 }
 0x6c4   :  { %1007 = shalt.err (!%p1004_p5)  }
 0x6c5   :  { %s1008_s14 = scalar_lea.hbm %s1274_s7, 16  ;;  %p1013_p6 = scmp.lt.u32.totalorder %s1274_s7, %s1380_s6 }
 0x6c6   :  { %p1009_p7 = scmp.ne.s32.totalorder %s1274_s7, %s1008_s14  ;;  %p1014_p11 = scmp.lt.u32.totalorder %s1245_s15, %s1008_s14 }
 0x6c7   :  { %p1016_p12 = scmp.lt.u32.totalorder %s1008_s14, %s1274_s7 }
 0x6c8   :  { %p1010_p10 = pnand %p1009_p7, %p1208_p4  ;;  %p1015_p9 = por %p1014_p11, %p1013_p6 }
 0x6ca   :  { %p1011_p8 = pneg %p1010_p10  ;;  %p1017_p13 = por %p1016_p12, %p1015_p9 }
 0x6cc   :  { %p1018_p0 = pnand %p1017_p13, %p1011_p8 }
 0x6ce   :  { %1021 = shalt.err (!%p1018_p0)  }
 0x6cf   :  { %832 = dma.vmem_to_hbm [thread:$0]  (%p1208_p4), %s1262_s19, 16, %s1274_s7, [#allocation3 + $0x1] }
 0x6d0   :  { %s752_s16 = sshll.u32 %s1258_s20, 4  ;;  %s754_s17 = sshll.u32 %s1260_s23, 4 }
 0x6d1   :  { %s624_s24 = scalar_lea.hbm %s1380_s6, %s752_s16  ;;  %s1322_s28 = scalar_lea.hbm %s1380_s6, %s754_s17 }
 0x6d2   :  { %s1022_s29 = scalar_lea.vmem %s1264_s22, 16  ;;  %p1029_p5 = scmp.lt.s32.totalorder %s1264_s22, %s1224_s8 }
 0x6d3   :  { %p1023_p1 = scmp.ne.s32.totalorder %s1264_s22, %s1022_s29  ;;  %p1030_p7 = scmp.lt.s32.totalorder %s1229_s5, %s1022_s29 }
 0x6d5   :  { %p1024_p2 = pnand %p1023_p1, %p1208_p4  ;;  %p1031_p10 = por %p1030_p7, %p1029_p5 }
 0x6d7   :  { %p1025_p3 = pneg %p1024_p2 }
 0x6d9   :  { %p1032_p8 = pnand %p1031_p10, %p1025_p3 }
 0x6db   :  { %1035 = shalt.err (!%p1032_p8)  }
 0x6dc   :  { %s1036_s19 = scalar_lea.hbm %s624_s24, 16  ;;  %p1041_p12 = scmp.lt.u32.totalorder %s624_s24, %s1380_s6 }
 0x6dd   :  { %p1037_p6 = scmp.ne.s32.totalorder %s624_s24, %s1036_s19  ;;  %p1042_p13 = scmp.lt.u32.totalorder %s1245_s15, %s1036_s19 }
 0x6de   :  { %p1044_p1 = scmp.lt.u32.totalorder %s1036_s19, %s624_s24 }
 0x6df   :  { %p1038_p11 = pnand %p1037_p6, %p1208_p4  ;;  %p1043_p0 = por %p1042_p13, %p1041_p12 }
 0x6e1   :  { %p1039_p9 = pneg %p1038_p11  ;;  %p1045_p2 = por %p1044_p1, %p1043_p0 }
 0x6e3   :  { %p1046_p5 = pnand %p1045_p2, %p1039_p9 }
 0x6e5   :  { %1049 = shalt.err (!%p1046_p5)  }
 0x6e6   :  { %833 = dma.vmem_to_hbm [thread:$0]  (%p1208_p4), %s1264_s22, 16, %s624_s24, [#allocation3 + $0x2] }
 0x6e7   :  { %s1050_s3 = scalar_lea.vmem %s650_s4, 16  ;;  %p1057_p8 = scmp.lt.s32.totalorder %s650_s4, %s1224_s8 }
 0x6e8   :  { %p1051_p3 = scmp.ne.s32.totalorder %s650_s4, %s1050_s3  ;;  %p1058_p6 = scmp.lt.s32.totalorder %s1229_s5, %s1050_s3 }
 0x6ea   :  { %p1052_p7 = pnand %p1051_p3, %p1208_p4  ;;  %p1059_p11 = por %p1058_p6, %p1057_p8 }
 0x6ec   :  { %p1053_p10 = pneg %p1052_p7 }
 0x6ee   :  { %p1060_p12 = pnand %p1059_p11, %p1053_p10 }
 0x6f0   :  { %1063 = shalt.err (!%p1060_p12)  }
 0x6f1   :  { %s1064_s30 = scalar_lea.hbm %s1322_s28, 16  ;;  %p1069_p1 = scmp.lt.u32.totalorder %s1322_s28, %s1380_s6 }
 0x6f2   :  { %p1065_p9 = scmp.ne.s32.totalorder %s1322_s28, %s1064_s30  ;;  %p1070_p2 = scmp.lt.u32.totalorder %s1245_s15, %s1064_s30 }
 0x6f3   :  { %p1072_p3 = scmp.lt.u32.totalorder %s1064_s30, %s1322_s28 }
 0x6f4   :  { %p1066_p13 = pnand %p1065_p9, %p1208_p4  ;;  %p1071_p5 = por %p1070_p2, %p1069_p1 }
 0x6f6   :  { %p1067_p0 = pneg %p1066_p13  ;;  %p1073_p7 = por %p1072_p3, %p1071_p5 }
 0x6f8   :  { %p1074_p10 = pnand %p1073_p7, %p1067_p0 }
 0x6fa   :  { %1077 = shalt.err (!%p1074_p10)  }
 0x6fb   :  { %834 = dma.vmem_to_hbm [thread:$0]  (%p1208_p4), %s650_s4, 16, %s1322_s28, [#allocation3 + $0x3] }
 0x6fc   :  { %1087 = dma.done.wait (%p1208_p4), [#allocation3], 16 }
 0x6fd   :  { %1089 = vsyncadd (%p1208_p4), [#allocation3], 4294967280 }
 0x6fe   :  { %1091 = dma.done.wait (%p1208_p4), [#allocation3 + $0x1], 16 }
 0x6ff   :  { %1093 = vsyncadd (%p1208_p4), [#allocation3 + $0x1], 4294967280 }
 0x700   :  { %1095 = dma.done.wait (%p1208_p4), [#allocation3 + $0x2], 16 }
 0x701   :  { %1097 = vsyncadd (%p1208_p4), [#allocation3 + $0x2], 4294967280 }
 0x702   :  { %1099 = dma.done.wait (%p1208_p4), [#allocation3 + $0x3], 16 }
 0x703   :  { %1101 = vsyncadd (%p1208_p4), [#allocation3 + $0x3], 4294967280 }
 0x704   :  { %670 = vsyncpa [#allocation5], 1 }
 0x705   :  { %671 = vsyncpa [#allocation6], 1 }
 0x706   :  { %672 = vsyncmov [#allocation3] }
 0x709   :  { %s673_s6 = vpop.sfrf %672 }
 0x70a   :  { %p755_p8 = scmp.ne.s32.totalorder %s673_s6, 0 }
 0x70c   :  { %677 = shalt.err (%p755_p8)  }
 0x70d   :  { %679 = vsyncmov [#allocation3 + $0x1] }
 0x710   :  { %s680_s8 = vpop.sfrf %679 }
 0x711   :  { %p756_p6 = scmp.ne.s32.totalorder %s680_s8, 0 }
 0x713   :  { %684 = shalt.err (%p756_p6)  }
 0x714   :  { %686 = vsyncmov [#allocation3 + $0x2] }
 0x717   :  { %s687_s5 = vpop.sfrf %686 }
 0x718   :  { %p757_p11 = scmp.ne.s32.totalorder %s687_s5, 0 }
 0x71a   :  { %691 = shalt.err (%p757_p11)  }
 0x71b   :  { %693 = vsyncmov [#allocation3 + $0x3] }
 0x71e   :  { %s694_s15 = vpop.sfrf %693 }
 0x71f   :  { %p758_p12 = scmp.ne.s32.totalorder %s694_s15, 0 }
 0x721   :  { %698 = shalt.err (%p758_p12)  }

</bundles_post_ra>
